<compile_context>
chip_gen: v7x
topology: tpu7x:2x2x1
jax: 0.10.0
libtpu: 0.0.40
codegen_flags: <defaults>
</compile_context>

<pallas_src>
import functools

import jax
import jax.numpy as jnp
import numpy as np
from jax.experimental import pallas as pl
from jax.experimental.pallas import tpu as pltpu


# ---------------------------------------------------------------------------
# Small helpers
# ---------------------------------------------------------------------------

def _vmem_limit_bytes():
    """Per-generation scoped-VMEM limit (defaults are 16/32 MiB and too small for
    realistic D, S).  Conservative 56 MiB on unknown / v7x (64 MiB physical),
    100 MiB on v5e/v6e (128 MiB physical)."""
    try:
        kind = jax.devices()[0].device_kind.lower()
    except Exception:  # pragma: no cover
        kind = ""
    if "v5" in kind or "v6" in kind:
        return 100 * 1024 * 1024
    return 56 * 1024 * 1024


def _layernorm(x, w, b, eps=1e-5):
    """LayerNorm over the last axis. x: (S, D) f32; w, b: (1, D) f32."""
    mu = jnp.mean(x, axis=-1, keepdims=True)
    xc = x - mu
    var = jnp.mean(xc * xc, axis=-1, keepdims=True)
    return xc * jax.lax.rsqrt(var + eps) * w + b


def _erf_poly(x):
    """Abramowitz & Stegun 7.1.26 erf approximation (max abs err ~1.5e-7).
    Built from exp/mul/add/where only so it lowers on Mosaic."""
    a1, a2, a3, a4, a5 = 0.254829592, -0.284496736, 1.421413741, -1.453152027, 1.061405429
    p = 0.3275911
    ax = jnp.abs(x)
    t = 1.0 / (1.0 + p * ax)
    poly = t * (a1 + t * (a2 + t * (a3 + t * (a4 + t * a5))))
    y = 1.0 - poly * jnp.exp(-ax * ax)
    return jnp.where(x < 0.0, -y, y)


def _gelu_exact(x):
    """Exact (erf-based) GELU, matching torch.nn.GELU() defaults."""
    return 0.5 * x * (1.0 + _erf_poly(x * 0.7071067811865476))


# ---------------------------------------------------------------------------
# Kernel 1: embedding gather (manual multi-DMA) + positional embedding
# ---------------------------------------------------------------------------

def _embed_kernel(ids_ref, emb_hbm, pe_ref, o_ref, xs, sems, *, nbuf):
    b = pl.program_id(0)
    S = xs.shape[0]

    def issue(s):
        tok = ids_ref[b, s]
        pltpu.make_async_copy(
            emb_hbm.at[pl.ds(tok, 1)], xs.at[pl.ds(s, 1)], sems.at[s % nbuf]).start()

    # Prime up to `nbuf` in-flight row DMAs.
    @pl.loop(0, nbuf)
    def _prime(s):
        issue(s)

    # Consume row s, keep the DMA window full.
    @pl.loop(0, S)
    def _consume(s):
        pltpu.make_async_copy(
            emb_hbm.at[pl.ds(0, 1)], xs.at[pl.ds(s, 1)], sems.at[s % nbuf]).wait()

        @pl.when(s + nbuf < S)
        def _():
            issue(s + nbuf)

    # Single lane/sublane-dense (S, D) store per batch element.
    o_ref[0] = (xs[...] + pe_ref[...]).astype(o_ref.dtype)


def embed_with_positions(token_ids, embed_table, pe_s):
    """token_ids (B,S) int32, embed_table (V,D), pe_s (S,D) -> (B,S,D)."""
    B, S = token_ids.shape
    V, D = embed_table.shape
    nbuf = min(8, S)
    kernel = functools.partial(_embed_kernel, nbuf=nbuf)
    return pl.pallas_call(
        kernel,
        out_shape=jax.ShapeDtypeStruct((B, S, D), embed_table.dtype),
        grid_spec=pltpu.PrefetchScalarGridSpec(
            num_scalar_prefetch=1,
            grid=(B,),
            in_specs=[
                pl.BlockSpec(memory_space=pl.ANY),                 # embed table stays in HBM
                pl.BlockSpec((S, D), lambda b, ids: (0, 0),
                             pipeline_mode=pl.Buffered(1)),        # constant PE slab
            ],
            out_specs=pl.BlockSpec((1, S, D), lambda b, ids: (b, 0, 0)),
            scratch_shapes=[
                pltpu.VMEM((S, D), embed_table.dtype),
                pltpu.SemaphoreType.DMA((nbuf,)),
            ],
        ),
        compiler_params=pltpu.CompilerParams(
            dimension_semantics=("parallel",),
            vmem_limit_bytes=_vmem_limit_bytes()),
    )(token_ids.astype(jnp.int32), embed_table, pe_s)


# ---------------------------------------------------------------------------
# Kernel 2: one fused transformer encoder layer (per batch element)
# ---------------------------------------------------------------------------

def _encoder_layer_kernel(x_ref, ln1w_ref, ln1b_ref, wqkv_ref, bqkv_ref,
                          wo_ref, bo_ref, ln2w_ref, ln2b_ref,
                          w1_ref, b1_ref, w2_ref, b2_ref,
                          o_ref, cat_ref, *, n_heads, head_dim):
    x = x_ref[0].astype(jnp.float32)          # (S, D) residual stream in f32
    S, D = x.shape

    # ---- MHA branch: x_n = W_o(concat_h attn_h(LN1(x))) + b_o -------------
    h = _layernorm(x, ln1w_ref[...], ln1b_ref[...]).astype(jnp.bfloat16)

    # Fused Q/K/V projection for all heads: one bf16 MXU matmul, f32 accumulation.
    # 1/sqrt(head_dim) is pre-folded into the Wq/bq columns on the host.
    qkv = jnp.dot(h, wqkv_ref[...], preferred_element_type=jnp.float32) + bqkv_ref[...]

    # TODO(synk): for long S, tile q/kv blocks with online softmax (flash-style) so the
    #             (S,S) f32 scores never materialize (required for v7x 64 MiB VMEM).
    for hd in range(n_heads):
        lo = hd * head_dim
        qh = qkv[:, lo:lo + head_dim].astype(jnp.bfloat16)              # (S, H) pre-scaled
        kh = qkv[:, D + lo:D + lo + head_dim].astype(jnp.bfloat16)      # (S, H)
        vh = qkv[:, 2 * D + lo:2 * D + lo + head_dim].astype(jnp.bfloat16)

        # QK^T without materializing k.T: contract the H axis of both operands.
        scores = jax.lax.dot_general(
            qh, kh, (((1,), (1,)), ((), ())),
            preferred_element_type=jnp.float32)                          # (S, S) f32

        m = jnp.max(scores, axis=-1, keepdims=True)
        p = jnp.exp(scores - m)
        denom = jnp.sum(p, axis=-1, keepdims=True)
        attn = (p * pl.reciprocal(denom, approx=True)).astype(jnp.bfloat16)  # EUP vrcp

        head_out = jnp.dot(attn, vh, preferred_element_type=jnp.float32)     # (S, H)
        # Write the head output into its column slot; one K=D W_o matmul after the loop
        # (bounds the (S,S) temporaries' live ranges via the scratch ref as well).
        cat_ref[:, lo:lo + head_dim] = head_out.astype(cat_ref.dtype)

    x_n = jnp.dot(cat_ref[...], wo_ref[...],
                  preferred_element_type=jnp.float32) + bo_ref[...]           # (S, D)

    # ---- MLP branch + residual: out = x + MLP(LN2(x_n)) --------------------
    h2 = _layernorm(x_n, ln2w_ref[...], ln2b_ref[...]).astype(jnp.bfloat16)
    # TODO(synk): chunk the 4*D hidden dim (stream w_mlp1/w_mlp2 slices) for large D on v7x.
    hid = jnp.dot(h2, w1_ref[...], preferred_element_type=jnp.float32) + b1_ref[...]
    hid = _gelu_exact(hid).astype(jnp.bfloat16)
    mlp_out = jnp.dot(hid, w2_ref[...], preferred_element_type=jnp.float32) + b2_ref[...]

    o_ref[0] = (x + mlp_out).astype(o_ref.dtype)


def encoder_layer(x, fused, *, n_heads):
    B, S, D = x.shape
    head_dim = D // n_heads
    kernel = functools.partial(_encoder_layer_kernel,
                               n_heads=n_heads, head_dim=head_dim)

    def const(shape):
        # Constant index map over grid=(B,): single-buffer (no wasted double buffer).
        return pl.BlockSpec(shape, lambda b: (0,) * len(shape),
                            pipeline_mode=pl.Buffered(1))

    return pl.pallas_call(
        kernel,
        out_shape=jax.ShapeDtypeStruct((B, S, D), x.dtype),
        grid_spec=pltpu.PrefetchScalarGridSpec(
            num_scalar_prefetch=0,
            grid=(B,),
            in_specs=[
                pl.BlockSpec((1, S, D), lambda b: (b, 0, 0)),   # x
                const((1, D)), const((1, D)),                    # ln1 w, b
                const((D, 3 * D)), const((1, 3 * D)),            # fused Wqkv (bf16), bqkv
                const((D, D)), const((1, D)),                    # W_o (bf16), b_o
                const((1, D)), const((1, D)),                    # ln2 w, b
                const((D, 4 * D)), const((1, 4 * D)),            # MLP W1 (bf16), b1
                const((4 * D, D)), const((1, D)),                # MLP W2 (bf16), b2
            ],
            out_specs=pl.BlockSpec((1, S, D), lambda b: (b, 0, 0)),
            scratch_shapes=[pltpu.VMEM((S, D), jnp.bfloat16)],   # concat(head outputs)
        ),
        compiler_params=pltpu.CompilerParams(
            dimension_semantics=("parallel",),
            vmem_limit_bytes=_vmem_limit_bytes()),
    )(x, fused["ln1_w"], fused["ln1_b"], fused["w_qkv"], fused["b_qkv"],
      fused["w_o"], fused["b_o"], fused["ln2_w"], fused["ln2_b"],
      fused["w_mlp1"], fused["b_mlp1"], fused["w_mlp2"], fused["b_mlp2"])


# ---------------------------------------------------------------------------
# Kernel 3: pooling gather -> (B, D) slab -> single projection matmul + L2 norm
# ---------------------------------------------------------------------------

def _pool_project_kernel(idx_ref, x_ref, proj_ref, o_ref, rows_ref):
    del idx_ref  # only used by the index_maps (scalar prefetch)
    b = pl.program_id(0)
    rows_ref[pl.ds(b, 1), :] = x_ref[0].astype(rows_ref.dtype)   # gathered row -> slab

    @pl.when(b == pl.num_programs(0) - 1)
    def _():
        v = jnp.dot(rows_ref[...], proj_ref[...], preferred_element_type=jnp.float32)
        ss = jnp.sum(v * v, axis=-1, keepdims=True)
        # tiny eps guards a zero projection vector (torch would produce NaN there).
        o_ref[...] = (v * jax.lax.rsqrt(ss + 1e-12)).astype(o_ref.dtype)


def pool_project_normalize(x, idx, proj):
    B, S, D = x.shape
    E = proj.shape[1]
    return pl.pallas_call(
        _pool_project_kernel,
        out_shape=jax.ShapeDtypeStruct((B, E), x.dtype),
        grid_spec=pltpu.PrefetchScalarGridSpec(
            num_scalar_prefetch=1,
            grid=(B,),
            in_specs=[
                pl.BlockSpec((1, 1, D), lambda b, idx: (b, idx[b], 0)),  # gather row idx[b]
                pl.BlockSpec((D, E), lambda b, idx: (0, 0),
                             pipeline_mode=pl.Buffered(1)),              # constant proj
            ],
            # Single (B, E) output block, revisited across the grid -> axis is "arbitrary".
            out_specs=pl.BlockSpec((B, E), lambda b, idx: (0, 0)),
            scratch_shapes=[pltpu.VMEM((B, D), jnp.float32)],
        ),
        compiler_params=pltpu.CompilerParams(
            dimension_semantics=("arbitrary",),
            vmem_limit_bytes=_vmem_limit_bytes()),
    )(idx.astype(jnp.int32), x, proj)


# ---------------------------------------------------------------------------
# Host-side parameter prep (hoisted out of the forward) / full forward
# ---------------------------------------------------------------------------

def fuse_layer_params(lp, *, n_heads, head_dim):
    """Concatenate per-head Q/K/V linears into one (D, 3D) weight; fold the
    1/sqrt(head_dim) attention scale into the Q columns; cast the large matmul
    weights to bf16 (MXU fast path, half the DMA/VMEM bytes); reshape biases/LN to 2-D."""
    D = lp["wo"].shape[0]
    scale = 1.0 / float(np.sqrt(head_dim))
    wq_all = jnp.concatenate([lp["wq"][h] for h in range(n_heads)], axis=1)  # (D, D)
    wk_all = jnp.concatenate([lp["wk"][h] for h in range(n_heads)], axis=1)
    wv_all = jnp.concatenate([lp["wv"][h] for h in range(n_heads)], axis=1)
    w_qkv = jnp.concatenate([wq_all * scale, wk_all, wv_all], axis=1).astype(jnp.bfloat16)
    b_qkv = jnp.concatenate([lp["bq"].reshape(-1) * scale,
                             lp["bk"].reshape(-1),
                             lp["bv"].reshape(-1)]).reshape(1, 3 * D)
    return dict(
        ln1_w=lp["ln1_w"].reshape(1, D), ln1_b=lp["ln1_b"].reshape(1, D),
        w_qkv=w_qkv, b_qkv=b_qkv,
        w_o=lp["wo"].astype(jnp.bfloat16), b_o=lp["bo"].reshape(1, D),
        ln2_w=lp["ln2_w"].reshape(1, D), ln2_b=lp["ln2_b"].reshape(1, D),
        w_mlp1=lp["w1"].astype(jnp.bfloat16), b_mlp1=lp["b1"].reshape(1, -1),
        w_mlp2=lp["w2"].astype(jnp.bfloat16), b_mlp2=lp["b2"].reshape(1, D),
    )


def prepare_params(params, *, n_heads):
    """One-time (load-time) parameter fusion, hoisted out of the per-call forward."""
    D = params["embed"].shape[1]
    head_dim = D // n_heads
    return dict(
        embed=params["embed"], pe=params["pe"], proj=params["proj"],
        layers=[fuse_layer_params(lp, n_heads=n_heads, head_dim=head_dim)
                for lp in params["layers"]],
    )


def text_encoder_forward(text, mask, prepared, *, n_heads):
    B, S = text.shape
    x = embed_with_positions(text, prepared["embed"], prepared["pe"][:S])
    for fused in prepared["layers"]:
        x = encoder_layer(x, fused, n_heads=n_heads)
    # mask is only used for pooling (matches the PyTorch code, where the attention
    # masking branch is a no-op).
    idx = (jnp.sum(mask[:, 0], axis=1) - 1).astype(jnp.int32)
    return pool_project_normalize(x, idx, prepared["proj"])


# ---------------------------------------------------------------------------
# Pure-JAX reference (mirrors the PyTorch module op-for-op, full f32)
# ---------------------------------------------------------------------------

def _ref_layernorm(x, w, b, eps=1e-5):
    mu = jnp.mean(x, axis=-1, keepdims=True)
    var = jnp.mean((x - mu) ** 2, axis=-1, keepdims=True)
    return (x - mu) / jnp.sqrt(var + eps) * w + b


def reference_forward(text, mask, params, *, n_heads):
    D = params["embed"].shape[1]
    H = D // n_heads
    B, S = text.shape
    x = params["embed"][text] + params["pe"][:S][None, :, :]
    for lp in params["layers"]:
        h = _ref_layernorm(x, lp["ln1_w"], lp["ln1_b"])
        heads = []
        for hd in range(n_heads):
            q = h @ lp["wq"][hd] + lp["bq"][hd]
            k = h @ lp["wk"][hd] + lp["bk"][hd]
            v = h @ lp["wv"][hd] + lp["bv"][hd]
            att = jnp.einsum("bqd,bkd->bqk", q, k) / (H ** 0.5)
            att = jax.nn.softmax(att, axis=-1)
            heads.append(jnp.einsum("bqk,bkd->bqd", att, v))
        x_n = jnp.concatenate(heads, axis=-1) @ lp["wo"] + lp["bo"]
        h2 = _ref_layernorm(x_n, lp["ln2_w"], lp["ln2_b"])
        mlp = jax.nn.gelu(h2 @ lp["w1"] + lp["b1"], approximate=False) @ lp["w2"] + lp["b2"]
        x = x + mlp
    idx = (jnp.sum(mask[:, 0], axis=1) - 1).astype(jnp.int32)
    pooled = x[jnp.arange(B), idx]
    out = pooled @ params["proj"]
    return out / jnp.linalg.norm(out, axis=-1, keepdims=True)


# ---------------------------------------------------------------------------
# Parameter construction
# ---------------------------------------------------------------------------

def init_params(key, vocab_size, d_model, max_seq_length, n_layers, n_heads, emb_dim):
    H = d_model // n_heads
    keys = jax.random.split(key, 2 + n_layers)
    embed = jax.random.normal(keys[0], (vocab_size, d_model), jnp.float32)
    proj = jax.random.normal(keys[1], (d_model, emb_dim), jnp.float32)

    # Sinusoidal positional table, same formula as the PyTorch PositionalEmbedding.
    pos = jnp.arange(max_seq_length, dtype=jnp.float32)[:, None]
    div = jnp.exp(jnp.arange(0, d_model, 2, dtype=jnp.float32)
                  * (-np.log(10000.0) / d_model))
    pe = jnp.zeros((max_seq_length, d_model), jnp.float32)
    pe = pe.at[:, 0::2].set(jnp.sin(pos * div))
    pe = pe.at[:, 1::2].set(jnp.cos(pos * div))

    def lin(kk, fan_in, shape):
        lim = 1.0 / float(np.sqrt(fan_in))
        return jax.random.uniform(kk, shape, jnp.float32, -lim, lim)

    layers = []
    for li in range(n_layers):
        k = jax.random.split(keys[2 + li], 16)
        layers.append(dict(
            ln1_w=1.0 + 0.1 * jax.random.normal(k[0], (d_model,), jnp.float32),
            ln1_b=0.1 * jax.random.normal(k[1], (d_model,), jnp.float32),
            wq=lin(k[2], d_model, (n_heads, d_model, H)),
            bq=lin(k[3], d_model, (n_heads, H)),
            wk=lin(k[4], d_model, (n_heads, d_model, H)),
            bk=lin(k[5], d_model, (n_heads, H)),
            wv=lin(k[6], d_model, (n_heads, d_model, H)),
            bv=lin(k[7], d_model, (n_heads, H)),
            wo=lin(k[8], d_model, (d_model, d_model)),
            bo=lin(k[9], d_model, (d_model,)),
            ln2_w=1.0 + 0.1 * jax.random.normal(k[10], (d_model,), jnp.float32),
            ln2_b=0.1 * jax.random.normal(k[11], (d_model,), jnp.float32),
            w1=lin(k[12], d_model, (d_model, 4 * d_model)),
            b1=lin(k[13], d_model, (4 * d_model,)),
            w2=lin(k[14], 4 * d_model, (4 * d_model, d_model)),
            b2=lin(k[15], 4 * d_model, (d_model,)),
        ))
    return dict(embed=embed, pe=pe, proj=proj, layers=layers)


if __name__ == "__main__":
    vocab_size, d_model, max_seq_length = 64, 32, 16
    n_layers, n_heads, emb_dim = 2, 4, 16
    B, S = 2, 8

    key = jax.random.PRNGKey(0)
    kp, kt = jax.random.split(key)
    params = init_params(kp, vocab_size, d_model, max_seq_length,
                         n_layers, n_heads, emb_dim)
    prepared = prepare_params(params, n_heads=n_heads)   # hoisted: fused once, reused

    text = jax.random.randint(kt, (B, S), 0, vocab_size, dtype=jnp.int32)
    lengths = jnp.array([S, 5], dtype=jnp.int32)
    mask = (jnp.arange(S)[None, :] < lengths[:, None]).astype(jnp.float32)[:, None, :]

    out = text_encoder_forward(text, mask, prepared, n_heads=n_heads)
    out = jax.block_until_ready(out)

    ref = reference_forward(text, mask, params, n_heads=n_heads)
    assert out.shape == (B, emb_dim)
    # bf16 MXU operands (weights + activations) plus approx reciprocal / erf polynomial
    # introduce ~1%-level relative error on the unit-norm output; check direction + abs.
    max_err = float(jnp.max(jnp.abs(out - ref)))
    min_cos = float(jnp.min(jnp.sum(out * ref, axis=-1)))
    assert max_err < 5e-2, f"mismatch vs reference: max abs err {max_err}"
    assert min_cos > 0.995, f"mismatch vs reference: min cosine {min_cos}"

    print("KERNEL_OK")
</pallas_src>

<mosaic_0001>
module attributes {stable_mosaic.version = 11 : i64} {
  func.func @_embed_kernel(%arg0: i32, %arg1: memref<2x8xi32, #tpu.memory_space<smem>>, %arg2: memref<64x32xf32, #tpu.memory_space<any>>, %arg3: memref<8x32xf32, #tpu.memory_space<vmem>>, %arg4: memref<1x8x32xf32, #tpu.memory_space<vmem>>, %arg5: memref<8x32xf32, #tpu.memory_space<vmem>>, %arg6: memref<8x!tpu.dma_semaphore, #tpu.memory_space<semaphore_mem>>) attributes {dimension_semantics = [#tpu.dimension_semantics<parallel>], iteration_bounds = array<i64: 2>, scalar_prefetch = 1 : i64, scratch_operands = 2 : i64, tpu.core_type = #tpu.core_type<tc>, window_params = [{}, {pipeline_mode = #tpu.pipeline_mode<synchronous>, transform_indices = @transform_1, window_bounds = array<i64: 8, 32>}, {transform_indices = @transform_2, window_bounds = array<i64: 1, 8, 32>}]} {
    %c0_i32 = arith.constant 0 : i32
    %c8_i32 = arith.constant 8 : i32
    %0 = arith.addi %c0_i32, %c8_i32 : i32
    %c1_i32 = arith.constant 1 : i32
    scf.for %arg7 = %c0_i32 to %0 step %c1_i32  : i32 {
      %c1_i32_11 = arith.constant 1 : i32
      %8 = arith.muli %arg7, %c1_i32_11 : i32
      %c0_i32_12 = arith.constant 0 : i32
      %9 = arith.addi %c0_i32_12, %8 : i32
      %10 = arith.index_cast %arg0 : i32 to index
      %11 = arith.index_cast %9 : i32 to index
      %12 = memref.load %arg1[%10, %11] : memref<2x8xi32, #tpu.memory_space<smem>>
      %c8_i32_13 = arith.constant 8 : i32
      %c0_i32_14 = arith.constant 0 : i32
      %13 = arith.cmpi eq, %c8_i32_13, %c0_i32_14 : i32
      %c1_i32_15 = arith.constant 1 : i32
      %14 = arith.select %13, %c1_i32_15, %c8_i32_13 : i32
      %15 = arith.remsi %9, %14 : i32
      %c0_i32_16 = arith.constant 0 : i32
      %16 = arith.cmpi ne, %15, %c0_i32_16 : i32
      %c0_i32_17 = arith.constant 0 : i32
      %17 = arith.cmpi slt, %15, %c0_i32_17 : i32
      %c0_i32_18 = arith.constant 0 : i32
      %18 = arith.cmpi slt, %14, %c0_i32_18 : i32
      %19 = arith.xori %17, %18 : i1
      %20 = arith.andi %19, %16 : i1
      %21 = arith.addi %15, %14 : i32
      %22 = arith.select %20, %21, %15 : i32
      %c0_i32_19 = arith.constant 0 : i32
      %23 = tpu.memref_slice %arg2[%12, %c0_i32_19] : memref<64x32xf32, #tpu.memory_space<any>> -> memref<1x32xf32, #tpu.memory_space<any>>
      %c0_i32_20 = arith.constant 0 : i32
      %24 = tpu.memref_slice %arg5[%9, %c0_i32_20] : memref<8x32xf32, #tpu.memory_space<vmem>> -> memref<1x32xf32, #tpu.memory_space<vmem>>
      %25 = tpu.memref_slice %arg6[%22] : memref<8x!tpu.dma_semaphore, #tpu.memory_space<semaphore_mem>> -> memref<1x!tpu.dma_semaphore, #tpu.memory_space<semaphore_mem>>
      %26 = tpu.memref_squeeze %25 : memref<1x!tpu.dma_semaphore, #tpu.memory_space<semaphore_mem>> -> memref<!tpu.dma_semaphore, #tpu.memory_space<semaphore_mem>>
      tpu.enqueue_dma source(%23 : memref<1x32xf32, #tpu.memory_space<any>>) target(%24 : memref<1x32xf32, #tpu.memory_space<vmem>>) target_semaphore(%26 : memref<!tpu.dma_semaphore, #tpu.memory_space<semaphore_mem>>)
    }
    %c8_i32_0 = arith.constant 8 : i32
    %c0_i32_1 = arith.constant 0 : i32
    %c8_i32_2 = arith.constant 8 : i32
    %1 = arith.addi %c0_i32_1, %c8_i32_2 : i32
    %c1_i32_3 = arith.constant 1 : i32
    scf.for %arg7 = %c0_i32_1 to %1 step %c1_i32_3  : i32 {
      %c1_i32_11 = arith.constant 1 : i32
      %8 = arith.muli %arg7, %c1_i32_11 : i32
      %c0_i32_12 = arith.constant 0 : i32
      %9 = arith.addi %c0_i32_12, %8 : i32
      %c8_i32_13 = arith.constant 8 : i32
      %c0_i32_14 = arith.constant 0 : i32
      %10 = arith.cmpi eq, %c8_i32_13, %c0_i32_14 : i32
      %c1_i32_15 = arith.constant 1 : i32
      %11 = arith.select %10, %c1_i32_15, %c8_i32_13 : i32
      %12 = arith.remsi %9, %11 : i32
      %c0_i32_16 = arith.constant 0 : i32
      %13 = arith.cmpi ne, %12, %c0_i32_16 : i32
      %c0_i32_17 = arith.constant 0 : i32
      %14 = arith.cmpi slt, %12, %c0_i32_17 : i32
      %c0_i32_18 = arith.constant 0 : i32
      %15 = arith.cmpi slt, %11, %c0_i32_18 : i32
      %16 = arith.xori %14, %15 : i1
      %17 = arith.andi %16, %13 : i1
      %18 = arith.addi %12, %11 : i32
      %19 = arith.select %17, %18, %12 : i32
      %c0_i32_19 = arith.constant 0 : i32
      %c0_i32_20 = arith.constant 0 : i32
      %20 = tpu.memref_slice %arg2[%c0_i32_19, %c0_i32_20] : memref<64x32xf32, #tpu.memory_space<any>> -> memref<1x32xf32, #tpu.memory_space<any>>
      %c0_i32_21 = arith.constant 0 : i32
      %21 = tpu.memref_slice %arg5[%9, %c0_i32_21] : memref<8x32xf32, #tpu.memory_space<vmem>> -> memref<1x32xf32, #tpu.memory_space<vmem>>
      %22 = tpu.memref_slice %arg6[%19] : memref<8x!tpu.dma_semaphore, #tpu.memory_space<semaphore_mem>> -> memref<1x!tpu.dma_semaphore, #tpu.memory_space<semaphore_mem>>
      %23 = tpu.memref_squeeze %22 : memref<1x!tpu.dma_semaphore, #tpu.memory_space<semaphore_mem>> -> memref<!tpu.dma_semaphore, #tpu.memory_space<semaphore_mem>>
      tpu.wait_dma2 semaphore(%23 : memref<!tpu.dma_semaphore, #tpu.memory_space<semaphore_mem>>) src(%20 : memref<1x32xf32, #tpu.memory_space<any>>) dst(%21 : memref<1x32xf32, #tpu.memory_space<vmem>>)
      %c8_i32_22 = arith.constant 8 : i32
      %24 = arith.addi %9, %c8_i32_22 : i32
      %c8_i32_23 = arith.constant 8 : i32
      %25 = arith.cmpi slt, %24, %c8_i32_23 : i32
      %26 = arith.extui %25 : i1 to i32
      %c0_i32_24 = arith.constant 0 : i32
      %27 = arith.cmpi ne, %26, %c0_i32_24 : i32
      scf.if %27 {
        %c8_i32_25 = arith.constant 8 : i32
        %28 = arith.addi %9, %c8_i32_25 : i32
        %29 = arith.index_cast %arg0 : i32 to index
        %30 = arith.index_cast %28 : i32 to index
        %31 = memref.load %arg1[%29, %30] : memref<2x8xi32, #tpu.memory_space<smem>>
        %c8_i32_26 = arith.constant 8 : i32
        %c0_i32_27 = arith.constant 0 : i32
        %32 = arith.cmpi eq, %c8_i32_26, %c0_i32_27 : i32
        %c1_i32_28 = arith.constant 1 : i32
        %33 = arith.select %32, %c1_i32_28, %c8_i32_26 : i32
        %34 = arith.remsi %28, %33 : i32
        %c0_i32_29 = arith.constant 0 : i32
        %35 = arith.cmpi ne, %34, %c0_i32_29 : i32
        %c0_i32_30 = arith.constant 0 : i32
        %36 = arith.cmpi slt, %34, %c0_i32_30 : i32
        %c0_i32_31 = arith.constant 0 : i32
        %37 = arith.cmpi slt, %33, %c0_i32_31 : i32
        %38 = arith.xori %36, %37 : i1
        %39 = arith.andi %38, %35 : i1
        %40 = arith.addi %34, %33 : i32
        %41 = arith.select %39, %40, %34 : i32
        %c0_i32_32 = arith.constant 0 : i32
        %42 = tpu.memref_slice %arg2[%31, %c0_i32_32] : memref<64x32xf32, #tpu.memory_space<any>> -> memref<1x32xf32, #tpu.memory_space<any>>
        %c0_i32_33 = arith.constant 0 : i32
        %43 = tpu.memref_slice %arg5[%28, %c0_i32_33] : memref<8x32xf32, #tpu.memory_space<vmem>> -> memref<1x32xf32, #tpu.memory_space<vmem>>
        %44 = tpu.memref_slice %arg6[%41] : memref<8x!tpu.dma_semaphore, #tpu.memory_space<semaphore_mem>> -> memref<1x!tpu.dma_semaphore, #tpu.memory_space<semaphore_mem>>
        %45 = tpu.memref_squeeze %44 : memref<1x!tpu.dma_semaphore, #tpu.memory_space<semaphore_mem>> -> memref<!tpu.dma_semaphore, #tpu.memory_space<semaphore_mem>>
        tpu.enqueue_dma source(%42 : memref<1x32xf32, #tpu.memory_space<any>>) target(%43 : memref<1x32xf32, #tpu.memory_space<vmem>>) target_semaphore(%45 : memref<!tpu.dma_semaphore, #tpu.memory_space<semaphore_mem>>)
      } else {
      }
    }
    %c8_i32_4 = arith.constant 8 : i32
    %c0 = arith.constant 0 : index
    %c0_5 = arith.constant 0 : index
    %2 = vector.load %arg5[%c0, %c0_5] : memref<8x32xf32, #tpu.memory_space<vmem>>, vector<8x32xf32>
    %c0_6 = arith.constant 0 : index
    %c0_7 = arith.constant 0 : index
    %3 = vector.load %arg3[%c0_6, %c0_7] : memref<8x32xf32, #tpu.memory_space<vmem>>, vector<8x32xf32>
    %4 = arith.addf %2, %3 : vector<8x32xf32>
    %c0_8 = arith.constant 0 : index
    %c0_9 = arith.constant 0 : index
    %c0_10 = arith.constant 0 : index
    %5 = vector.load %arg4[%c0_8, %c0_9, %c0_10] : memref<1x8x32xf32, #tpu.memory_space<vmem>>, vector<1x8x32xf32>
    %6 = vector.shape_cast %5 : vector<1x8x32xf32> to vector<8x32xf32>
    %7 = vector.shape_cast %4 : vector<8x32xf32> to vector<1x8x32xf32>
    tpu.vector_store %arg4[%c0_8, %c0_9, %c0_10], %7 {strides = array<i32>} : memref<1x8x32xf32, #tpu.memory_space<vmem>>, vector<1x8x32xf32>,
    return
  }
  func.func @transform_1(%arg0: i32, %arg1: memref<2x8xi32, #tpu.memory_space<smem>>) -> (i32, i32) {
    %c0_i32 = arith.constant 0 : i32
    %c0_i32_0 = arith.constant 0 : i32
    %c0_i32_1 = arith.constant 0 : i32
    return %c0_i32, %c0_i32_0 : i32, i32
  }
  func.func @transform_2(%arg0: i32, %arg1: memref<2x8xi32, #tpu.memory_space<smem>>) -> (i32, i32, i32) {
    %c0_i32 = arith.constant 0 : i32
    %c0_i32_0 = arith.constant 0 : i32
    %c0_i32_1 = arith.constant 0 : i32
    return %arg0, %c0_i32, %c0_i32_0 : i32, i32, i32
  }
}

</mosaic_0001>

<bundles_post_ra>
// kernel: tpu_custom_call.1
= control target key start
LH: loop header
LB: loop body
LE: loop exit
PB: predicated region body
PF: predicated region fallthrough
CT: control target
= control target key end

     0   :  { %s767_s0 = inlined_call_operand.vmem [shape: s32[2,8], index: 0, kind: input, shape index: {}]   ;;  %s768_s1 = inlined_call_operand.vmem [shape: f32[64,32], index: 1, kind: input, shape index: {}]   ;;  %s769_s2 = inlined_call_operand.vmem [shape: f32[8,32], index: 2, kind: input, shape index: {}]   ;;  %s770_s3 = inlined_call_operand.hbm [shape: f32[2,8,32], index: 3, kind: output, shape index: {}]  }
   0x1   :  { %s8_s14 = sshll.u32 %s767_s0, 4  ;;  %s9_s14 = int_to_ptr.vmem [resolvable:$true] %s8_s14 }
   0x2   :  { %s516_s15 = scalar_lea.vmem %s9_s14, 32  ;;  %p521_p1 = scmp.lt.s32.totalorder %s9_s14, %s9_s14 }
   0x3   :  { %p517_p0 = scmp.ne.s32.totalorder %s9_s14, %s516_s15  ;;  %p522_p2 = scmp.lt.s32.totalorder %s516_s15, %s516_s15 }
   0x5   :  { %p523_p3 = por %p522_p2, %p521_p1 }
   0x7   :  { %p524_p4 = pnand %p523_p3, %p517_p0 }
   0x9   :  { %527 = shalt.err (!%p524_p4)  }
   0xa   :  { %s612_s16 = smov [#allocation5]  }
   0xb   :  { %11 = dma.vmem_to_smem %s9_s14, 32, %s612_s16, [#allocation4] }
   0xc   :  { %580 = dma.done.wait [#allocation4], 32 }
   0xd   :  { %581 = vsyncadd [#allocation4], 4294967264 }
   0xe   :  { %13 = sfence }
   0xf   :  { %14 = vsyncpa [#allocation7], 0 }
  0x10   :  { %16 = vsyncpa [#allocation7 + $0x1], 0  ;;  %s637_s17 = smov 0   ;;  %s639_s18 = smov 0  }
  0x11   :  { %s641_s0 = smov 0   ;;  %s643_s19 = smov 0  }
  0x12 LB: > { %s658_s20 = sadd.s32 4294967295, %s602_s19   ;;  %s430_s21 = sadd.s32 4294967294, %s602_s19   ;;  %s602_s19 = sphi %s643_s19, %s778_s19   ;;  %s598_s0 = sphi %s641_s0, %s777_s0   ;;  %s594_s18 = sphi %s639_s18, %s776_s18   ;;  %s590_s17 = sphi %s637_s17, %s775_s17  }
  0x13   : > { %s662_s22 = sadd.s32 1, %s602_s19   ;;  %s50_s23 = sadd.s32 1, %s598_s0 }
  0x14   : > { %s47_s24 = ssub.s32 %s602_s19, %s662_s22  ;;  %p60_p5 = scmp.ne.s32.totalorder %s598_s0, %s594_s18 }
  0x15   : > { %p48_p6 = scmp.eq.s32.totalorder %s47_s24, 0  ;;  %p61_p7 = scmp.eq.s32.totalorder %s658_s20, 1 }
  0x16   : > { %p66_p8 = scmp.ne.s32.totalorder %s594_s18, %s590_s17  ;;  %p67_p9 = scmp.eq.s32.totalorder %s430_s21, 1 }
  0x17   : > { %s673_s25 = scalar_select %p48_p6, %s598_s0, %s50_s23  }
  0x18   : > { %p675_p10 = por %p61_p7, %p60_p5  ;;  %p679_p11 = por %p67_p9, %p66_p8 }
  0x19   : > { %p432_p12 = scmp.ge.s32.totalorder %s602_s19, 1  ;;  %p88_p13 = scmp.lt.s32.totalorder %s602_s19, 3 }
  0x1b   : > { %p89_p0 = pnand %p432_p12, %p88_p13 }
  0x1c   : > { %s771_s28 = sand.u32 (!%p89_p0), 1, %s594_s18   ;;  %s604_s4 = smov (!%p89_p0), 0  }
  0x1d   : > { %92 = sbr.rel (%p89_p0) target bundleno = 113 (0x71), region = 24  ;;  %s688_s29 = sshll.u32 (!%p89_p0), %s771_s28, 3 }
  0x1e   : > { %s102_s30 = scalar_lea.vmem (!%p89_p0), [#allocation6], %s688_s29 }
  0x24 LB: >> { %s109_s5 = sshra.s32 %s606_s4, 7  ;;  %s114_s6 = sand.u32 127, %s606_s4  ;;  %s606_s4 = sphi %s604_s4, %s108_s4  }
  0x25   : >> { %s111_s7 = sadd.s32 %s658_s20, %s109_s5  ;;  %p117_p1 = scmp.lt.s32.totalorder %s606_s4, 0 }
  0x26   : >> { %s434_s8 = sshll.u32 %s111_s7, 7  ;;  %s118_s9 = ssub.s32 0, %s606_s4 }
  0x27   : >> { %s115_s10 = sadd.s32 %s434_s8, %s114_s6  ;;  %s435_s11 = smin.u32 %s606_s4, %s118_s9 }
  0x28   : >> { %s116_s12 = sld [smem:[#allocation5 + %s115_s10]]  ;;  %s120_s13 = sand.u32 7, %s435_s11  }
  0x29   : >> { %s121_s14 = ssub.s32 0, %s120_s13  ;;  %s130_s24 = scalar_lea.vmem [#allocation2], %s606_s4 }
  0x2a   : >> { %s780_s14 = smov (!%p117_p1, %s121_s14), %s120_s13 }
  0x2b   : >> { %p437_p2 = scmp.lt.s32.totalorder %s780_s14, 0  ;;  %s127_s15 = sadd.s32 8, %s780_s14 }
  0x2d   : >> { %s782_s15 = smov (!%p437_p2, %s127_s15), %s780_s14 }
  0x2e   : >> { %s129_s23 = scalar_lea.vmem %s768_s1, %s116_s12  ;;  %s131_s5 = scalar_lea.sflag [#allocation3], %s782_s15 }
  0x2f   : >> { %v149_v0 = vld [vmem:[%s129_s23] sm:$0x1] }
  0x30   : >> { %150 = vst [vmem:[%s130_s24] sm:$0x1] %v149_v0 }
  0x31   : >> { %175 = vsyncadd %s131_s5, 16  ;;  %s108_s4 = sadd.s32 1, %s606_s4  }
  0x32   : >> { %p105_p3 = scmp.ge.s32.totalorder %s108_s4, 8  }
  0x33   : > { %s695_s6 = smov (%p105_p3), 0  }
  0x34   : > { %107 = sbr.rel (!%p105_p3) target bundleno = 36 (0x24), region = 168 }
  0x3b LB: >> { %p182_p4 = scmp.lt.s32.totalorder %s610_s6, 0  ;;  %s183_s7 = ssub.s32 0, %s610_s6  ;;  %s610_s6 = sphi %s695_s6, %s181_s6  }
  0x3c   : >> { %s438_s8 = smin.u32 %s610_s6, %s183_s7 }
  0x3d   : >> { %s185_s9 = sand.u32 7, %s438_s8  }
  0x3e   : >> { %s186_s10 = ssub.s32 0, %s185_s9 }
  0x3f   : >> { %s784_s10 = smov (!%p182_p4, %s186_s10), %s185_s9 }
  0x40   : >> { %p440_p5 = scmp.lt.s32.totalorder %s784_s10, 0  ;;  %s192_s11 = sadd.s32 8, %s784_s10 }
  0x42   : >> { %s786_s11 = smov (!%p440_p5, %s192_s11), %s784_s10 }
  0x43   : >> { %s194_s4 = scalar_lea.sflag [#allocation3], %s786_s11 }
  0x44   : >> { %582 = dma.done.wait %s194_s4, 16 }
  0x45   : >> { %583 = vsyncadd %s194_s4, 4294967280  ;;  %s198_s12 = sadd.s32 8, %s610_s6 }
  0x46   : >> { %p441_p6 = scmp.ge.s32.totalorder %s198_s12, 8 }
  0x47   : >> { %s203_s13 = sshra.s32 (!%p441_p6), %s198_s12, 7  ;;  %s208_s14 = sand.u32 (!%p441_p6), 127, %s198_s12 }
  0x48   : >> { %202 = sbr.rel (%p441_p6) target bundleno = 85 (0x55), region = 72  ;;  %s205_s15 = sadd.s32 (!%p441_p6), %s658_s20, %s203_s13 }
  0x49   : >> { %p211_p7 = scmp.lt.s32.totalorder (!%p441_p6), %s198_s12, 0  ;;  %s442_s16 = sshll.u32 (!%p441_p6), %s205_s15, 7 }
  0x4a   : >> { %s212_s21 = ssub.s32 (!%p441_p6), 0, %s198_s12  ;;  %s209_s23 = sadd.s32 (!%p441_p6), %s442_s16, %s208_s14 }
  0x4b   : >> { %s443_s24 = smin.u32 (!%p441_p6), %s212_s21, %s198_s12  ;;  %s210_s5 = sld [smem:[#allocation5 + %s209_s23]] (!%p441_p6) }
  0x4c   : >> { %s214_s7 = sand.u32 (!%p441_p6), 7, %s443_s24   ;;  %s375_s28 = scalar_lea.vmem (!%p441_p6), [#allocation2], %s610_s6 }
  0x4d   : >> { %s215_s8 = ssub.s32 (!%p441_p6), 0, %s214_s7 }
  0x4f   : >> { %s788_s8 = smov (!%p211_p7, %s215_s8), %s214_s7 }
  0x50   : >> { %p445_p8 = scmp.lt.s32.totalorder %s788_s8, 0  ;;  %s221_s9 = sadd.s32 8, %s788_s8 }
  0x51   : >> { %s223_s4 = scalar_lea.vmem %s768_s1, %s210_s5 }
  0x52   : >> { %s790_s9 = smov (!%p445_p8, %s221_s9), %s788_s8  ;;  %v243_v1 = vld [vmem:[%s223_s4] sm:$0x1] }
  0x53   : >> { %447 = vst [vmem:[%s375_s28 + $0x8] sm:$0x1] %v243_v1  ;;  %s225_s13 = scalar_lea.sflag [#allocation3], %s790_s9 }
  0x54   : >> { %269 = vsyncadd %s225_s13, 16 }
  0x55 PF: >> { %s181_s6 = sadd.s32 1, %s610_s6  }
  0x56   : >> { %p178_p9 = scmp.ge.s32.totalorder %s181_s6, 8  }
  0x57   : > { %v271_v3 = vld [vmem:[%s769_s2] sm:$0xff] (%p178_p9)  ;;  %vm273_vm0 = vcmask (%p178_p9), 261120   ;;  %s449_s28 = sshll.u32 (%p178_p9), %s658_s20, 7  ;;  %s289_s6 = sshll.u32 (%p178_p9), %s102_s30, 4  ;;  %s723_s6 = int_to_ptr.vmem [resolvable:$true] %s289_s6 }
  0x58   : > { %180 = sbr.rel (!%p178_p9) target bundleno = 59 (0x3b), region = 179  ;;  %s719_s21 = scalar_lea.hbm (%p178_p9), %s770_s3, %s449_s28 }
  0x59   : > { %s774_s23 = sand.u32 (%p178_p9), 1, %s594_s18   ;;  %s528_s5 = scalar_lea.vmem (%p178_p9), %s723_s6, 128 }
  0x5a   : > { %v270_v2 = vld [vmem:[#allocation2] sm:$0xff] (%p178_p9)  ;;  %s276_s24 = scalar_lea.sflag (%p178_p9), [#allocation7], %s774_s23  ;;  %p529_p12 = scmp.ne.s32.totalorder (%p178_p9), %s723_s6, %s528_s5 }
  0x5b   : > { %v272_v4 = vadd.f32 (%p178_p9), %v271_v3, %v270_v2  ;;  %s613_s20 = smov (%p178_p9), [#allocation6]  }
  0x5c   : > { %p530_p13 = pnand (%p178_p9), %p529_p12, %p675_p10  ;;  %s532_s7 = sshll.u32 (%p178_p9), %s613_s20, 4  ;;  %s533_s7 = int_to_ptr.vmem [resolvable:$false] %s532_s7 }
  0x5d   : > { %274 = vst.msk [vmem:[%s102_s30] sm:$0xff] (%p178_p9), %vm273_vm0, %v272_v4  ;;  %s534_s8 = scalar_lea.vmem (%p178_p9), %s533_s7, 256  ;;  %p535_p1 = scmp.lt.s32.totalorder (%p178_p9), %s723_s6, %s533_s7 }
  0x5e   : > { %p531_p0 = pneg (%p178_p9), %p530_p13  ;;  %p536_p2 = scmp.lt.s32.totalorder (%p178_p9), %s534_s8, %s528_s5 }
  0x60   : > { %p537_p3 = por %p536_p2, %p535_p1 }
  0x62   : > { %p538_p4 = pnand %p537_p3, %p531_p0 }
  0x64   : > { %541 = shalt.err (!%p538_p4)
}
  0x65   : > { %s542_s29 = scalar_lea.hbm %s719_s21, 128  ;;  %s546_s10 = scalar_lea.hbm %s770_s3, 256 }
  0x66   : > { %p543_p5 = scmp.ne.s32.totalorder %s719_s21, %s542_s29  ;;  %p547_p8 = scmp.lt.u32.totalorder %s719_s21, %s770_s3 }
  0x67   : > { %p548_p9 = scmp.lt.u32.totalorder %s546_s10, %s542_s29  ;;  %p550_p13 = scmp.lt.u32.totalorder %s542_s29, %s719_s21 }
  0x68   : > { %p544_p6 = pnand %p543_p5, %p675_p10 }
  0x69   : > { %p549_p12 = por %p548_p9, %p547_p8 }
  0x6a   : > { %p545_p7 = pneg %p544_p6 }
  0x6b   : > { %p551_p0 = por %p550_p13, %p549_p12 }
  0x6d   : > { %p552_p1 = pnand %p551_p0, %p545_p7 }
  0x6f   : > { %555 = shalt.err (!%p552_p1)
}
  0x70   : > { %460 = dma.vmem_to_hbm [thread:$0]  (%p675_p10), %s723_s6, 128, %s719_s21, %s276_s24  }
  0x71 PF: > { %p466_p2 = scmp.ge.s32.totalorder %s602_s19, 2  ;;  %s301_s13 = sand.u32 1, %s590_s17  }
  0x72   : > { %s302_s12 = scalar_lea.sflag [#allocation7], %s301_s13 }
  0x73   : > { %p463_p3 = pnand %p466_p2, %p679_p11 }
  0x75   : > { %585 = dma.done.wait (!%p463_p3), %s302_s12, 128  }
  0x76   : > { %587 = vsyncadd (!%p463_p3), %s302_s12, 4294967168  ;;  %p19_p4 = scmp.ge.s32.totalorder %s662_s22, 4   ;;  %s775_s17 = smov %s594_s18 }
  0x77   : > { %s776_s18 = smov %s598_s0  ;;  %s777_s0 = smov %s673_s25 }
  0x78   : > { %s778_s19 = smov %s662_s22  ;;  %21 = sbr.rel (!%p19_p4) target bundleno = 18 (0x12), region = 190 }
  0x7f   :  { %307 = vsyncpa [#allocation7], 1 }
  0x80   :  { %309 = vsyncpa [#allocation7 + $0x1], 1 }
  0x81   :  { %310 = vsyncmov [#allocation3] }
  0x84   :  { %s311_s19 = vpop.sfrf %310 }
  0x85   :  { %p452_p10 = scmp.ne.s32.totalorder %s311_s19, 0 }
  0x87   :  { %315 = shalt.err (%p452_p10)  }
  0x88   :  { %317 = vsyncmov [#allocation3 + $0x1] }
  0x8b   :  { %s318_s26 = vpop.sfrf %317 }
  0x8c   :  { %p453_p11 = scmp.ne.s32.totalorder %s318_s26, 0 }
  0x8e   :  { %322 = shalt.err (%p453_p11)  }
  0x8f   :  { %324 = vsyncmov [#allocation3 + $0x2] }
  0x92   :  { %s325_s27 = vpop.sfrf %324 }
  0x93   :  { %p454_p5 = scmp.ne.s32.totalorder %s325_s27, 0 }
  0x95   :  { %329 = shalt.err (%p454_p5)  }
  0x96   :  { %331 = vsyncmov [#allocation3 + $0x3] }
  0x99   :  { %s332_s14 = vpop.sfrf %331 }
  0x9a   :  { %p455_p6 = scmp.ne.s32.totalorder %s332_s14, 0 }
  0x9c   :  { %336 = shalt.err (%p455_p6)  }
  0x9d   :  { %338 = vsyncmov [#allocation3 + $0x4] }
  0xa0   :  { %s339_s22 = vpop.sfrf %338 }
  0xa1   :  { %p456_p7 = scmp.ne.s32.totalorder %s339_s22, 0 }
  0xa3   :  { %343 = shalt.err (%p456_p7)  }
  0xa4   :  { %345 = vsyncmov [#allocation3 + $0x5] }
  0xa7   :  { %s346_s1 = vpop.sfrf %345 }
  0xa8   :  { %p457_p8 = scmp.ne.s32.totalorder %s346_s1, 0 }
  0xaa   :  { %350 = shalt.err (%p457_p8)  }
  0xab   :  { %352 = vsyncmov [#allocation3 + $0x6] }
  0xae   :  { %s353_s2 = vpop.sfrf %352 }
  0xaf   :  { %p458_p9 = scmp.ne.s32.totalorder %s353_s2, 0 }
  0xb1   :  { %357 = shalt.err (%p458_p9)  }
  0xb2   :  { %359 = vsyncmov [#allocation3 + $0x7] }
  0xb5   :  { %s360_s3 = vpop.sfrf %359 }
  0xb6   :  { %p459_p12 = scmp.ne.s32.totalorder %s360_s3, 0 }
  0xb8   :  { %364 = shalt.err (%p459_p12)  }

</bundles_post_ra>
